<compile_context>
chip_gen: v7x
topology: tpu7x:2x2x1
jax: 0.10.0
libtpu: 0.0.40
codegen_flags: <defaults>
</compile_context>

<pallas_src>
import math

import jax
import jax.numpy as jnp
from jax.experimental import pallas as pl
from jax.experimental.pallas import tpu as pltpu

_N_PAD = 128            # lane-dense output width (one full vreg lane dim)
_SPLIT_THRESHOLD = 256  # below this, a single full-batch block is used


def _slp_kernel(x_ref, w_ref, b_ref, o_ref):
    # x_ref: (TB, K)  narrow storage dtype -> widened to f32 (mirrors x.float())
    # w_ref: (K, 128) f32, zero-padded W^T (resident: constant index_map)
    # b_ref: (1, 128) f32, zero-padded bias
    # o_ref: (TB, 128) f32, lane-dense store; cols >= n_real are exactly zero
    x = x_ref[...].astype(jnp.float32)
    o_ref[...] = (
        jnp.dot(x, w_ref[...], preferred_element_type=jnp.float32) + b_ref[...]
    )


def prepare_slp_params(weight, bias, n_pad=_N_PAD):
    """One-time prep (hoisted out of the hot path): W -> W^T, f32, pad N->n_pad.

    weight: (N, K) like torch Linear. bias: (N,).
    Returns (w_pad (K, n_pad), b_pad (1, n_pad), n_real).
    """
    N, K = weight.shape
    assert bias.shape == (N,) and N <= n_pad
    w_pad = jnp.zeros((K, n_pad), jnp.float32).at[:, :N].set(
        weight.T.astype(jnp.float32)
    )
    b_pad = jnp.zeros((1, n_pad), jnp.float32).at[:, :N].set(
        bias.astype(jnp.float32)
    )
    return w_pad, b_pad, N


def _round_up(x, m):
    return ((x + m - 1) // m) * m


def _select_tile(B, tb):
    """Pick (TB, num_tiles).

    - B < 256: one full-batch block (block == full array dims is legal even
      when B is not a multiple of 8).
    - 256 <= B <= tb: split into 2 tiles so both v7x TensorCores get work.
    - B > tb: tb-sized tiles; the ragged edge block is masked by Pallas
      (no jnp.pad copy of the input).
    """
    tb = max(8, (tb // 8) * 8)
    if B < _SPLIT_THRESHOLD:
        return B, 1
    if B <= tb:
        TB = _round_up(pl.cdiv(B, 2), 8)
        return TB, pl.cdiv(B, TB)
    return tb, pl.cdiv(B, tb)


def slp_forward(x, prepared_params, tb=2048):
    """SLP forward: Flatten + Linear -> (B, output_size) float32.

    Contract: pass `x` in its storage dtype (bf16/int8/f32, ...) -- do NOT
    pre-cast to float32; the kernel widens in VMEM (mirrors torch `x.float()`)
    and a pre-cast would double the dominant HBM read traffic.

    `tb` is the batch tile. The 2048 default fits every generation's default
    scoped VMEM; on v7x keep tb <= ~4-6K (64 MiB VMEM/TC). If a larger tb is
    requested, vmem_limit_bytes is raised automatically.
    """
    w_pad, b_pad, n_real = prepared_params
    K, n_pad = w_pad.shape

    B = x.shape[0]
    x_flat = x.reshape(B, -1)                      # nn.Flatten (plain-JAX glue)
    assert x_flat.shape[1] == K

    TB, num_tiles = _select_tile(B, tb)

    # Roofline hint for XLA: this op is pure HBM streaming.
    bytes_accessed = int(
        B * K * x_flat.dtype.itemsize              # activation read
        + (K + 1) * n_pad * 4                      # resident weight + bias
        + B * n_pad * 4                            # output write
    )
    cost = pl.CostEstimate(
        flops=2 * B * K * n_pad, transcendentals=0, bytes_accessed=bytes_accessed
    )

    # Only raise the scoped-VMEM limit when a user-chosen tb actually needs it
    # (default tb fits v5e's 16 MiB default scoped VMEM).
    vmem_est = (
        2 * TB * (K * x_flat.dtype.itemsize + n_pad * 4)   # x + out, double-buffered
        + 2 * (K + 1) * n_pad * 4                          # weight + bias
    )
    cp_kwargs = dict(dimension_semantics=("parallel",))
    if vmem_est > (14 << 20):
        cp_kwargs["vmem_limit_bytes"] = int(min(vmem_est + (4 << 20), 64 << 20))

    out = pl.pallas_call(
        _slp_kernel,
        out_shape=jax.ShapeDtypeStruct((B, n_pad), jnp.float32),
        grid_spec=pl.GridSpec(
            grid=(num_tiles,),
            in_specs=[
                pl.BlockSpec((TB, K), lambda i: (i, 0)),      # batch tiles
                pl.BlockSpec((K, n_pad), lambda i: (0, 0)),   # W^T, fetched once
                pl.BlockSpec((1, n_pad), lambda i: (0, 0)),   # bias, fetched once
            ],
            out_specs=pl.BlockSpec((TB, n_pad), lambda i: (i, 0)),
        ),
        compiler_params=pltpu.CompilerParams(**cp_kwargs),
        cost_estimate=cost,
    )(x_flat, w_pad, b_pad)

    # Padded cols are exactly zero; slice back to the module's (B, 9).
    # (Consumers that can take the lane-dense (B, 128) slab directly should
    #  use `out` as-is and slice at the use-site to skip this extra pass.)
    return out[:, :n_real]


def init_slp_params(key, input_size=512, output_size=9):
    """Deterministic init mimicking torch.nn.Linear default (uniform bounds)."""
    k_w, k_b = jax.random.split(key)
    bound = 1.0 / math.sqrt(input_size)
    weight = jax.random.uniform(
        k_w, (output_size, input_size), jnp.float32, -bound, bound
    )
    bias = jax.random.uniform(k_b, (output_size,), jnp.float32, -bound, bound)
    return weight, bias


if __name__ == "__main__":
    key = jax.random.PRNGKey(0)
    k_x, k_p, k_x2, k_x3 = jax.random.split(key, 4)

    # (B, C, H, W) = (2, 2, 16, 16) -> flattens to (2, 512) = input_size default.
    x = jax.random.normal(k_x, (2, 2, 16, 16), dtype=jnp.float32)
    weight, bias = init_slp_params(k_p, input_size=512, output_size=9)

    params = prepare_slp_params(weight, bias)       # one-time, out of hot path

    out = jax.block_until_ready(slp_forward(x, params))
    ref = x.reshape(2, -1).astype(jnp.float32) @ weight.T + bias
    assert out.shape == (2, 9)
    assert jnp.allclose(out, ref, atol=1e-5, rtol=1e-5)

    # Two-tile split path (256 <= B <= tb) with a bf16 storage-dtype input and
    # a ragged edge block (608 > 600) -> no jnp.pad, in-kernel widen to f32.
    x2 = jax.random.normal(k_x2, (600, 512), dtype=jnp.bfloat16)
    out2 = jax.block_until_ready(slp_forward(x2, params))
    ref2 = x2.astype(jnp.float32) @ weight.T + bias
    assert out2.shape == (600, 9)
    assert jnp.allclose(out2, ref2, atol=1e-4, rtol=1e-4)

    # Multi-tile path (B > tb) with a non-divisible grid (300 = 2*128 + 44).
    x3 = jax.random.normal(k_x3, (300, 512), dtype=jnp.float32)
    out3 = jax.block_until_ready(slp_forward(x3, params, tb=128))
    ref3 = x3.astype(jnp.float32) @ weight.T + bias
    assert out3.shape == (300, 9)
    assert jnp.allclose(out3, ref3, atol=1e-5, rtol=1e-5)

    print("KERNEL_OK")
</pallas_src>

<mosaic_0001>
module attributes {stable_mosaic.version = 11 : i64} {
  func.func @_slp_kernel(%arg0: i32, %arg1: memref<2x512xf32, #tpu.memory_space<vmem>>, %arg2: memref<512x128xf32, #tpu.memory_space<vmem>>, %arg3: memref<1x128xf32, #tpu.memory_space<vmem>>, %arg4: memref<2x128xf32, #tpu.memory_space<vmem>>) attributes {dimension_semantics = [#tpu.dimension_semantics<parallel>], iteration_bounds = array<i64: 1>, scalar_prefetch = 0 : i64, scratch_operands = 0 : i64, tpu.core_type = #tpu.core_type<tc>, window_params = [{transform_indices = @transform_0, window_bounds = array<i64: 2, 512>}, {pipeline_mode = #tpu.pipeline_mode<synchronous>, transform_indices = @transform_1, window_bounds = array<i64: 512, 128>}, {pipeline_mode = #tpu.pipeline_mode<synchronous>, transform_indices = @transform_2, window_bounds = array<i64: 1, 128>}, {transform_indices = @transform_3, window_bounds = array<i64: 2, 128>}]} {
    %c0 = arith.constant 0 : index
    %c0_0 = arith.constant 0 : index
    %0 = vector.load %arg1[%c0, %c0_0] : memref<2x512xf32, #tpu.memory_space<vmem>>, vector<2x512xf32>
    %c0_1 = arith.constant 0 : index
    %c0_2 = arith.constant 0 : index
    %1 = vector.load %arg2[%c0_1, %c0_2] : memref<512x128xf32, #tpu.memory_space<vmem>>, vector<512x128xf32>
    %cst = arith.constant dense<0.000000e+00> : vector<2x128xf32>
    %2 = tpu.matmul %0, %1, %cst {dimension_numbers = #tpu.dot_dimension_numbers<[1], [0], [0], [1], [0, 0, 1, 1], [], []>} : vector<2x512xf32>, vector<512x128xf32>, vector<2x128xf32> -> vector<2x128xf32>
    %c0_3 = arith.constant 0 : index
    %c0_4 = arith.constant 0 : index
    %3 = vector.load %arg3[%c0_3, %c0_4] : memref<1x128xf32, #tpu.memory_space<vmem>>, vector<1x128xf32>
    %4 = vector.broadcast %3 : vector<1x128xf32> to vector<2x128xf32>
    %5 = arith.addf %2, %4 : vector<2x128xf32>
    %c0_5 = arith.constant 0 : index
    %c0_6 = arith.constant 0 : index
    %6 = vector.load %arg4[%c0_5, %c0_6] : memref<2x128xf32, #tpu.memory_space<vmem>>, vector<2x128xf32>
    tpu.vector_store %arg4[%c0_5, %c0_6], %5 {strides = array<i32>} : memref<2x128xf32, #tpu.memory_space<vmem>>, vector<2x128xf32>,
    return
  }
  func.func @transform_0(%arg0: i32) -> (i32, i32) {
    %c0_i32 = arith.constant 0 : i32
    %c0_i32_0 = arith.constant 0 : i32
    return %arg0, %c0_i32 : i32, i32
  }
  func.func @transform_1(%arg0: i32) -> (i32, i32) {
    %c0_i32 = arith.constant 0 : i32
    %c0_i32_0 = arith.constant 0 : i32
    %c0_i32_1 = arith.constant 0 : i32
    return %c0_i32, %c0_i32_0 : i32, i32
  }
  func.func @transform_2(%arg0: i32) -> (i32, i32) {
    %c0_i32 = arith.constant 0 : i32
    %c0_i32_0 = arith.constant 0 : i32
    %c0_i32_1 = arith.constant 0 : i32
    return %c0_i32, %c0_i32_0 : i32, i32
  }
  func.func @transform_3(%arg0: i32) -> (i32, i32) {
    %c0_i32 = arith.constant 0 : i32
    %c0_i32_0 = arith.constant 0 : i32
    return %arg0, %c0_i32 : i32, i32
  }
}

</mosaic_0001>

<bundles_post_ra>
// kernel: tpu_custom_call.1
= control target key start
LH: loop header
LB: loop body
LE: loop exit
PB: predicated region body
PF: predicated region fallthrough
CT: control target
= control target key end

     0   :  { %8 = vsyncpa [#allocation3], 0  ;;  %s578_s0 = inlined_call_operand.hbm [shape: f32[2,512], index: 0, kind: input, shape index: {}]   ;;  %s579_s1 = inlined_call_operand.hbm [shape: f32[512,128], index: 1, kind: input, shape index: {}]   ;;  %s580_s2 = inlined_call_operand.vmem [shape: f32[1,128], index: 2, kind: input, shape index: {}]   ;;  %s581_s3 = inlined_call_operand.hbm [shape: f32[2,128], index: 3, kind: output, shape index: {}]  }
   0x1   :  { %9 = vsyncpa [#allocation6], 0 }
   0x2   :  { %10 = vsyncpa [#allocation4], 0  ;;  %s506_s12 = smov [#allocation2]   ;;  %s507_s14 = smov [#allocation5]  }
   0x3   :  { %s17_s13 = sshll.u32 %s506_s12, 4  ;;  %s26_s15 = sshll.u32 %s507_s14, 4  ;;  %s18_s13 = int_to_ptr.vmem [resolvable:$true] %s17_s13  ;;  %s532_s15 = int_to_ptr.vmem [resolvable:$true] %s26_s15 }
   0x4   :  { %s434_s18 = scalar_lea.hbm %s578_s0, 128 }
   0x5   :  { %p435_p0 = scmp.ne.s32.totalorder %s578_s0, %s434_s18  ;;  %p438_p1 = scmp.lt.u32.totalorder %s434_s18, %s578_s0 }
   0x7   :  { %p440_p2 = pnand %p438_p1, %p435_p0 }
   0x9   :  { %443 = shalt.err (!%p440_p2)
}
   0xa   :  { %s444_s23 = scalar_lea.vmem %s18_s13, 128  ;;  %p449_p4 = scmp.lt.s32.totalorder %s18_s13, %s18_s13 }
   0xb   :  { %p445_p3 = scmp.ne.s32.totalorder %s18_s13, %s444_s23  ;;  %p450_p5 = scmp.lt.s32.totalorder %s444_s23, %s444_s23 }
   0xd   :  { %p451_p6 = por %p450_p5, %p449_p4 }
   0xf   :  { %p452_p7 = pnand %p451_p6, %p445_p3 }
  0x11   :  { %455 = shalt.err (!%p452_p7)
}
  0x12   :  { %20 = dma.hbm_to_vmem [thread:$0]  %s578_s0, 128, %s18_s13, [#allocation3]  }
  0x13   :  { %s456_s28 = scalar_lea.hbm %s579_s1, 8192 }
  0x14   :  { %p457_p8 = scmp.ne.s32.totalorder %s579_s1, %s456_s28  ;;  %p460_p9 = scmp.lt.u32.totalorder %s456_s28, %s579_s1 }
  0x16   :  { %p462_p10 = pnand %p460_p9, %p457_p8 }
  0x18   :  { %465 = shalt.err (!%p462_p10)
}
  0x19   :  { %s466_s6 = scalar_lea.vmem %s532_s15, 8192  ;;  %p471_p12 = scmp.lt.s32.totalorder %s532_s15, %s532_s15 }
  0x1a   :  { %p467_p11 = scmp.ne.s32.totalorder %s532_s15, %s466_s6  ;;  %p472_p13 = scmp.lt.s32.totalorder %s466_s6, %s466_s6 }
  0x1c   :  { %p473_p0 = por %p472_p13, %p471_p12 }
  0x1e   :  { %p474_p1 = pnand %p473_p0, %p467_p11 }
  0x20   :  { %477 = shalt.err (!%p474_p1)
}
  0x21   :  { %s508_s0 = smov 128   ;;  %s509_s7 = smov 8  }
  0x22   :  { %32 = dma.hbm_to_vmem [thread:$0]  %s579_s1, 8192, %s532_s15, [#allocation6], %s508_s0, %s508_s0, %s509_s7  }
  0x23   :  { %500 = dma.done.wait [#allocation3], 128  }
  0x24   :  { %501 = vsyncadd [#allocation3], 4294967168 }
  0x25   :  { %502 = dma.done.wait [#allocation6], 8192  }
  0x26   :  { %503 = vsyncadd [#allocation6], 4294959104  ;;  %v58_v0 = vld [vmem:[#allocation5 + $0x80] sm:$0xff]  ;;  %v59_v1 = vld [vmem:[#allocation5 + $0x88] sm:$0xff]  ;;  %v510_v47 = vmov 1983009808   ;;  %v118_v49 = vlaneseq }
  0x27   :  { %v42_v2 = vld [vmem:[#allocation5] sm:$0xff]  ;;  %v363_v3 = vpack.c.bf16 %v59_v1, %v58_v0  ;;  %v43_v4 = vld [vmem:[#allocation5 + $0x8] sm:$0xff]  ;;  %v60_v11 = vld [vmem:[#allocation5 + $0x90] sm:$0xff]  ;;  %v116_v48 = vunpack.c.l.s4 %v510_v47  ;;  %s511_s11 = smov [#allocation7]  }
  0x28   :  { %v90_v5 = vld [vmem:[#allocation5 + $0x180] sm:$0xff]  ;;  %v91_v6 = vld [vmem:[#allocation5 + $0x188] sm:$0xff]  ;;  %v365_v7 = vpack.c.bf16 %v43_v4, %v42_v2  ;;  %v61_v13 = vld [vmem:[#allocation5 + $0x98] sm:$0xff]  ;;  %v119_v0 = vshrl.u32 %v118_v49, 7  ;;  %s282_s12 = sshll.u32 %s511_s11, 4  ;;  %s283_s12 = int_to_ptr.vmem [resolvable:$true] %s282_s12 }
  0x29   :  { %v395_v8 = vpack.c.bf16 %v91_v6, %v90_v5  ;;  %v74_v9 = vld [vmem:[#allocation5 + $0x100] sm:$0xff]  ;;  %v75_v10 = vld [vmem:[#allocation5 + $0x108] sm:$0xff]  ;;  %364 = vmatprep.subr.bf16.mxu0 %v363_v3  ;;  %v44_v14 = vld [vmem:[#allocation5 + $0x10] sm:$0xff]  ;;  %v367_v16 = vpack.c.bf16 %v61_v13, %v60_v11  ;;  %v117_v63 = vunpack.c.0.s8 %v116_v48  ;;  %s478_s13 = scalar_lea.vmem %s283_s12, 32  ;;  %p483_p3 = scmp.lt.s32.totalorder %s283_s12, %s283_s12 }
  0x2a   :  { %v397_v12 = vpack.c.bf16 %v75_v10, %v74_v9  ;;  %v45_v15 = vld [vmem:[#allocation5 + $0x18] sm:$0xff]  ;;  %366 = vmatpush3.bf16.msra.mxu0 %v365_v7  ;;  %v92_v18 = vld [vmem:[#allocation5 + $0x190] sm:$0xff]  ;;  %v62_v23 = vld [vmem:[#allocation5 + $0xa0] sm:$0xff]  ;;  %p479_p2 = scmp.ne.s32.totalorder %s283_s12, %s478_s13  ;;  %p484_p4 = scmp.lt.s32.totalorder %s478_s13, %s478_s13 }
  0x2b   :  { %396 = vmatprep.subr.bf16.mxu1 %v395_v8  ;;  %v369_v17 = vpack.c.bf16 %v45_v15, %v44_v14  ;;  %v93_v19 = vld [vmem:[#allocation5 + $0x198] sm:$0xff]  ;;  %v76_v20 = vld [vmem:[#allocation5 + $0x110] sm:$0xff]  ;;  %v63_v24 = vld [vmem:[#allocation5 + $0xa8] sm:$0xff]  ;;  %368 = vmatprep.subr.bf16.mxu0 %v367_v16  ;;  %v120_v13 = vsub.s32 %v117_v63, %v119_v0 }
  0x2c   :  { %398 = vmatpush3.bf16.msra.mxu1 %v397_v12  ;;  %v399_v21 = vpack.c.bf16 %v93_v19, %v92_v18  ;;  %v77_v22 = vld [vmem:[#allocation5 + $0x118] sm:$0xff]  ;;  %v371_v26 = vpack.c.bf16 %v63_v24, %v62_v23  ;;  %v46_v27 = vld [vmem:[#allocation5 + $0x20] sm:$0xff]  ;;  %v47_v28 = vld [vmem:[#allocation5 + $0x28] sm:$0xff]  ;;  %p485_p5 = por %p484_p4, %p483_p3 }
  0x2d   :  { %v401_v25 = vpack.c.bf16 %v77_v22, %v76_v20  ;;  %v94_v29 = vld [vmem:[#allocation5 + $0x1a0] sm:$0xff]  ;;  %v95_v30 = vld [vmem:[#allocation5 + $0x1a8] sm:$0xff]  ;;  %v373_v33 = vpack.c.bf16 %v47_v28, %v46_v27  ;;  %v64_v35 = vld [vmem:[#allocation5 + $0xb0] sm:$0xff] }
  0x2e   :  { %400 = vmatprep.subr.bf16.mxu1 %v399_v21  ;;  %v78_v31 = vld [vmem:[#allocation5 + $0x120] sm:$0xff]  ;;  %v79_v32 = vld [vmem:[#allocation5 + $0x128] sm:$0xff]  ;;  %370 = vmatpush3.bf16.msra.mxu0 %v369_v17  ;;  %v403_v34 = vpack.c.bf16 %v95_v30, %v94_v29  ;;  %v65_v36 = vld [vmem:[#allocation5 + $0xb8] sm:$0xff]  ;;  %p486_p6 = pnand %p485_p5, %p479_p2 }
  0x2f   :  { %v48_v37 = vld [vmem:[#allocation5 + $0x30] sm:$0xff]  ;;  %372 = vmatprep.subr.bf16.mxu0 %v371_v26  ;;  %v405_v38 = vpack.c.bf16 %v79_v32, %v78_v31  ;;  %v375_v39 = vpack.c.bf16 %v65_v36, %v64_v35  ;;  %v49_v40 = vld [vmem:[#allocation5 + $0x38] sm:$0xff]  ;;  %v66_v46 = vld [vmem:[#allocation5 + $0xc0] sm:$0xff] }
  0x30   :  { %402 = vmatpush3.bf16.msra.mxu1 %v401_v25  ;;  %v96_v41 = vld [vmem:[#allocation5 + $0x1b0] sm:$0xff]  ;;  %v97_v42 = vld [vmem:[#allocation5 + $0x1b8] sm:$0xff]  ;;  %v67_v50 = vld [vmem:[#allocation5 + $0xc8] sm:$0xff]  ;;  %v377_v51 = vpack.c.bf16 %v49_v40, %v48_v37 }
  0x31   :  { %404 = vmatprep.subr.bf16.mxu1 %v403_v34  ;;  %v407_v43 = vpack.c.bf16 %v97_v42, %v96_v41  ;;  %v80_v44 = vld [vmem:[#allocation5 + $0x130] sm:$0xff]  ;;  %v81_v45 = vld [vmem:[#allocation5 + $0x138] sm:$0xff]  ;;  %v98_v52 = vld [vmem:[#allocation5 + $0x1c0] sm:$0xff]  ;;  %v379_v55 = vpack.c.bf16 %v67_v50, %v66_v46 }
  0x32   :  { %374 = vmatpush3.bf16.msra.mxu0 %v373_v33  ;;  %v99_v53 = vld [vmem:[#allocation5 + $0x1c8] sm:$0xff]  ;;  %v409_v54 = vpack.c.bf16 %v81_v45, %v80_v44  ;;  %v50_v56 = vld [vmem:[#allocation5 + $0x40] sm:$0xff]  ;;  %v68_v61 = vld [vmem:[#allocation5 + $0xd0] sm:$0xff] }
  0x33   :  { %376 = vmatprep.subr.bf16.mxu0 %v375_v39  ;;  %v51_v57 = vld [vmem:[#allocation5 + $0x48] sm:$0xff]  ;;  %v82_v58 = vld [vmem:[#allocation5 + $0x140] sm:$0xff]  ;;  %v411_v59 = vpack.c.bf16 %v99_v53, %v98_v52  ;;  %v69_v62 = vld [vmem:[#allocation5 + $0xd8] sm:$0xff] }
  0x34   :  { %406 = vmatpush3.bf16.msra.mxu1 %v405_v38  ;;  %v83_v60 = vld [vmem:[#allocation5 + $0x148] sm:$0xff]  ;;  %v100_v1 = vld [vmem:[#allocation5 + $0x1d0] sm:$0xff]  ;;  %v101_v2 = vld [vmem:[#allocation5 + $0x1d8] sm:$0xff]  ;;  %v381_v3 = vpack.c.bf16 %v51_v57, %v50_v56  ;;  %v383_v5 = vpack.c.bf16 %v69_v62, %v68_v61 }
  0x35   :  { %408 = vmatprep.subr.bf16.mxu1 %v407_v43  ;;  %v413_v4 = vpack.c.bf16 %v83_v60, %v82_v58  ;;  %v52_v6 = vld [vmem:[#allocation5 + $0x50] sm:$0xff]  ;;  %v53_v7 = vld [vmem:[#allocation5 + $0x58] sm:$0xff]  ;;  %v415_v9 = vpack.c.bf16 %v101_v2, %v100_v1  ;;  %v70_v11 = vld [vmem:[#allocation5 + $0xe0] sm:$0xff] }
  0x36   :  { %378 = vmatpush3.bf16.msra.mxu0 %v377_v51  ;;  %v84_v8 = vld [vmem:[#allocation5 + $0x150] sm:$0xff]  ;;  %v85_v10 = vld [vmem:[#allocation5 + $0x158] sm:$0xff]  ;;  %v71_v12 = vld [vmem:[#allocation5 + $0xe8] sm:$0xff]  ;;  %v385_v16 = vpack.c.bf16 %v53_v7, %v52_v6 }
  0x37   :  { %380 = vmatprep.subr.bf16.mxu0 %v379_v55  ;;  %v102_v14 = vld [vmem:[#allocation5 + $0x1e0] sm:$0xff]  ;;  %v103_v15 = vld [vmem:[#allocation5 + $0x1e8] sm:$0xff]  ;;  %v417_v18 = vpack.c.bf16 %v85_v10, %v84_v8  ;;  %v387_v19 = vpack.c.bf16 %v71_v12, %v70_v11  ;;  %v41_v22 = vld [vmem:[#allocation2] sm:$0xff] }
  0x38   :  { %410 = vmatpush3.bf16.msra.mxu1 %v409_v54  ;;  %v54_v17 = vld [vmem:[#allocation5 + $0x60] sm:$0xff]  ;;  %v55_v20 = vld [vmem:[#allocation5 + $0x68] sm:$0xff]  ;;  %v419_v23 = vpack.c.bf16 %v103_v15, %v102_v14  ;;  %v72_v25 = vld [vmem:[#allocation5 + $0xf0] sm:$0xff]  ;;  %v121_v27 = vrot.slane %v41_v22, %v120_v13  ;;  %v114_v28 = vcombine.high %v41_v22, %v41_v22 }
  0x39   :  { %412 = vmatprep.subr.bf16.mxu1 %v411_v59  ;;  %v86_v21 = vld [vmem:[#allocation5 + $0x160] sm:$0xff]  ;;  %v87_v24 = vld [vmem:[#allocation5 + $0x168] sm:$0xff]  ;;  %v73_v26 = vld [vmem:[#allocation5 + $0xf8] sm:$0xff]  ;;  %v389_v31 = vpack.c.bf16 %v55_v20, %v54_v17 }
  0x3a   :  { %382 = vmatpush3.bf16.msra.mxu0 %v381_v3  ;;  %v104_v29 = vld [vmem:[#allocation5 + $0x1f0] sm:$0xff]  ;;  %v105_v30 = vld [vmem:[#allocation5 + $0x1f8] sm:$0xff]  ;;  %v129_v32 = vcombine.high %v121_v27, %v121_v27  ;;  %v128_v33 = vrot.slane %v114_v28, %v120_v13  ;;  %v421_v34 = vpack.c.bf16 %v87_v24, %v86_v21  ;;  %v391_v35 = vpack.c.bf16 %v73_v26, %v72_v25 }
  0x3b   :  { %384 = vmatprep.subr.bf16.mxu0 %v383_v5  ;;  %v56_v36 = vld [vmem:[#allocation5 + $0x70] sm:$0xff]  ;;  %v57_v37 = vld [vmem:[#allocation5 + $0x78] sm:$0xff]  ;;  %v423_v38 = vpack.c.bf16 %v105_v30, %v104_v29 }
  0x3c   :  { %414 = vmatpush3.bf16.msra.mxu1 %v413_v4  ;;  %v88_v39 = vld [vmem:[#allocation5 + $0x170] sm:$0xff]  ;;  %v89_v40 = vld [vmem:[#allocation5 + $0x178] sm:$0xff]  ;;  %199 = vmatprep.mubr.f32.mxu0 %v129_v32  ;;  %v130_v41 = vcombine.high %v128_v33, %v128_v33  ;;  %v393_v42 = vpack.c.bf16 %v57_v37, %v56_v36 }
  0x3d   :  { %416 = vmatprep.subr.bf16.mxu1 %v415_v9  ;;  %v425_v43 = vpack.c.bf16 %v89_v40, %v88_v39  ;;  %v292_v45 = vld [vmem:[%s580_s2] ss:$0 sm:$0xff] }
  0x3e   :  { %386 = vmatpush3.bf16.msra.mxu0 %v385_v16  ;;  %269 = vmatprep.mubr.f32.mxu1 %v130_v41 }
  0x3f   :  { %388 = vmatprep.subr.bf16.mxu0 %v387_v19 }
  0x40   :  { %418 = vmatpush3.bf16.msra.mxu1 %v417_v18 }
  0x41   :  { %420 = vmatprep.subr.bf16.mxu1 %v419_v23 }
  0x42   :  { %390 = vmatpush3.bf16.msra.mxu0 %v389_v31 }
  0x43   :  { %392 = vmatprep.subr.bf16.mxu0 %v391_v35 }
  0x44   :  { %422 = vmatpush3.bf16.msra.mxu1 %v421_v34 }
  0x45   :  { %424 = vmatprep.subr.bf16.mxu1 %v423_v38 }
  0x46   :  { %394 = vmatpush3.bf16.msra.mxu0 %v393_v42 }
  0x48   :  { %426 = vmatpush3.bf16.msra.mxu1 %v425_v43 }
  0x49   :  { %200 = vmatmul.mubr.f32.vlgmr.msra.gmra.mrb[0].mxu0 %v121_v27 }
  0x4b   :  { %270 = vmatmul.mubr.f32.vlgmr.msra.gmra.mrb[0].mxu1 %v128_v33 }
 0x11c   :  { %v325_v44 = vpop.f32.mrb[0].mxu0 }
 0x11d   :  { %v326_v46 = vpop.f32.mrb[1].mxu0 }
 0x11e   :  { %v360_v47 = vpop.f32.mrb[0].mxu1  ;;  %v327_v48 = vadd.f32 %v326_v46, %v325_v44 }
 0x11f   :  { %v361_v49 = vpop.f32.mrb[1].mxu1 }
 0x120   :  { %v362_v50 = vadd.f32 %v361_v49, %v360_v47  ;;  %v202_v51 = vadd.f32 %v327_v48, %v292_v45 }
 0x122   :  { %v272_v52 = vadd.f32 %v362_v50, %v202_v51 }
 0x124   :  { %275 = vst [vmem:[#allocation7] sm:$0x3] %v272_v52 }
 0x125   :  { %489 = shalt.err (!%p486_p6)
}
 0x126   :  { %s490_s15 = scalar_lea.hbm %s581_s3, 32 }
 0x127   :  { %p491_p7 = scmp.ne.s32.totalorder %s581_s3, %s490_s15  ;;  %p494_p8 = scmp.lt.u32.totalorder %s490_s15, %s581_s3 }
 0x129   :  { %p496_p9 = pnand %p494_p8, %p491_p7 }
 0x12b   :  { %499 = shalt.err (!%p496_p9)
}
 0x12c   :  { %285 = dma.vmem_to_hbm [thread:$0]  %s283_s12, 32, %s581_s3, [#allocation4]  }
 0x12d   :  { %504 = dma.done.wait [#allocation4], 32  }
 0x12e   :  { %505 = vsyncadd [#allocation4], 4294967264 }
 0x12f   :  { %289 = vsyncpa [#allocation3], 1 }
 0x130   :  { %290 = vsyncpa [#allocation6], 1 }
 0x131   :  { %291 = vsyncpa [#allocation4], 1 }

</bundles_post_ra>
